<compile_context>
chip_gen: v5e
topology: v5e:2x2
jax: 0.10.0
libtpu: 0.0.40
codegen_flags: <defaults>
</compile_context>

<pallas_src>
import functools

import jax
import jax.numpy as jnp
from jax.experimental import pallas as pl
from jax.experimental.pallas import tpu as pltpu


def mlp_kernel(xt_ref, w1_ref, b1_ref, w2_ref, b2_ref, ot_ref, *, compute_dtype):
    # xt_ref: (1, TB)  -- batch tile on the 128-wide lane axis
    # w1_ref, b1_ref, w2_ref: (H, 1) columns in VMEM; b2_ref: (1, 1) scalar in SMEM
    xt = xt_ref[...].astype(compute_dtype)                   # (1, TB)
    w1 = w1_ref[...].astype(compute_dtype)                   # (H, 1)
    b1 = b1_ref[...].astype(compute_dtype)                   # (H, 1)

    # Layer 1 (K = input_dim = 1): VPU broadcast multiply-add + EUP tanh.
    # Runs in bf16 on v6e/v7x (bf16-native VPU/EUP), f32 elsewhere.
    h = jnp.tanh(w1 * xt + b1)                                # (H, TB)

    # Layer 2 (N = output_dim = 1): f32 weighted sublane reduction (XLU) + bias.
    out = jnp.sum(h.astype(jnp.float32) * w2_ref[...], axis=0, keepdims=True)
    out = out + b2_ref[0, 0]
    ot_ref[...] = out.astype(ot_ref.dtype)                    # (1, TB) lane-dense store


def _default_compute_dtype():
    """bf16 elementwise math on bf16-capable VPU/EUP generations, f32 otherwise."""
    try:
        kind = jax.devices()[0].device_kind.lower()
    except Exception:  # pragma: no cover - defensive; default backend is TPU
        return jnp.float32
    if "v6" in kind or "v7" in kind:
        return jnp.bfloat16
    return jnp.float32


def _pick_batch_tiling(batch, max_block_b):
    """Choose (block_b, grid_len) with batch % block_b == 0 -- never pads.

    Prefers the largest 128-multiple lane tile (<= max_block_b) that still
    leaves >= 2 grid steps (so v7x's two TensorCores both get work); falls
    back to the largest single block otherwise.
    """
    assert max_block_b >= 128
    if batch % 128 != 0:
        # Full-array block: exempt from the (8,128) divisibility rule, grid=(1,).
        return batch, 1
    m = batch // 128
    divs = [d for d in range(1, m + 1) if m % d == 0 and d * 128 <= max_block_b]
    multi = [d for d in divs if m // d >= 2]
    d = max(multi) if multi else max(divs)
    return d * 128, m // d


def mlp_forward(x, w1_col, b1_col, w2_col, b2, *, compute_dtype=None, max_block_b=8192):
    """x: (batch, 1). w1_col/b1_col/w2_col: (hidden, 1). b2: (1, 1).
    Returns (batch, 1) = tanh(x @ w1_col.T + b1_col.T) @ w2_col + b2."""
    batch, input_dim = x.shape
    hidden = w1_col.shape[0]
    assert input_dim == 1, "kernel specialized for input_dim == 1 (sin-regression MLP)"
    assert w2_col.shape == (hidden, 1) and b1_col.shape == (hidden, 1)
    assert b2.shape == (1, 1)

    if compute_dtype is None:
        compute_dtype = _default_compute_dtype()

    # Lane-dense layout: put batch on the fast (lane) axis. input_dim == 1 so
    # this reshape is layout-free (same row-major bytes as (batch, 1)).
    xt = x.reshape(1, batch)
    block_b, grid_len = _pick_batch_tiling(batch, max_block_b)

    kernel = functools.partial(mlp_kernel, compute_dtype=compute_dtype)

    out_t = pl.pallas_call(
        kernel,
        out_shape=jax.ShapeDtypeStruct((1, batch), x.dtype),
        grid=(grid_len,),
        in_specs=[
            pl.BlockSpec((1, block_b), lambda i: (0, i)),          # x batch tile (lanes)
            pl.BlockSpec((hidden, 1), lambda i: (0, 0)),           # W1 column (resident)
            pl.BlockSpec((hidden, 1), lambda i: (0, 0)),           # b1 column (resident)
            pl.BlockSpec((hidden, 1), lambda i: (0, 0)),           # W2 column (resident)
            pl.BlockSpec(memory_space=pltpu.MemorySpace.SMEM),     # b2 scalar
        ],
        out_specs=pl.BlockSpec((1, block_b), lambda i: (0, i)),
        compiler_params=pltpu.CompilerParams(
            dimension_semantics=("parallel",)),   # shards batch tiles across TCs on v7x
    )(xt, w1_col, b1_col, w2_col, b2)

    # (1, batch) -> (batch, 1): same row-major bytes, no pad/slice copies.
    return out_t.reshape(batch, 1)


def init_params(key, input_dim, hidden_dim, output_dim, dtype=jnp.float32):
    # Mimic PyTorch nn.Linear default init: U(-1/sqrt(fan_in), 1/sqrt(fan_in)).
    # Stored in the kernel's layout: W1 as its native (hidden, 1) column,
    # W2 transposed to a (hidden, 1) column, biases as a column / (1,1) scalar.
    assert input_dim == 1 and output_dim == 1
    k1, k2, k3, k4 = jax.random.split(key, 4)
    bound1 = 1.0 / (input_dim ** 0.5)
    bound2 = 1.0 / (hidden_dim ** 0.5)
    w1_col = jax.random.uniform(k1, (hidden_dim, 1), dtype, -bound1, bound1)  # l1.weight
    b1_col = jax.random.uniform(k2, (hidden_dim, 1), dtype, -bound1, bound1)  # l1.bias
    w2_col = jax.random.uniform(k3, (hidden_dim, 1), dtype, -bound2, bound2)  # l2.weight.T
    b2 = jax.random.uniform(k4, (1, 1), dtype, -bound2, bound2)               # l2.bias
    return w1_col, b1_col, w2_col, b2


if __name__ == "__main__":
    # sin-regression MLP shapes; batch = 2 full lane tiles so the tile picker
    # keeps two grid steps (both v7x TensorCores get work) without padding.
    batch, input_dim, hidden_dim, output_dim = 256, 1, 32, 1

    key = jax.random.PRNGKey(0)
    kx, kp = jax.random.split(key)
    x = jax.random.uniform(kx, (batch, input_dim), jnp.float32, -jnp.pi, jnp.pi)
    w1_col, b1_col, w2_col, b2 = init_params(kp, input_dim, hidden_dim, output_dim)

    # Reference: same math as the PyTorch forward  tanh(x @ W1.T + b1) @ W2.T + b2
    ref = jnp.tanh(x @ w1_col.T + b1_col.T) @ w2_col + b2[0, 0]

    # 1) Correctness check with full f32 elementwise math (tight tolerance).
    out_f32 = jax.block_until_ready(
        mlp_forward(x, w1_col, b1_col, w2_col, b2, compute_dtype=jnp.float32))
    assert out_f32.shape == (batch, output_dim)
    assert jnp.allclose(out_f32, ref, atol=1e-5, rtol=1e-5)

    # 2) Performance path with the auto-selected compute dtype
    #    (bf16 tanh on v6e/v7x, f32 on v5e and other backends).
    out = jax.block_until_ready(mlp_forward(x, w1_col, b1_col, w2_col, b2))
    assert out.shape == (batch, output_dim)
    assert jnp.allclose(out, ref, atol=1e-1)

    print("KERNEL_OK")
</pallas_src>

<mosaic_0001>
module attributes {stable_mosaic.version = 11 : i64} {
  func.func @mlp_kernel(%arg0: i32, %arg1: memref<1x128xf32, #tpu.memory_space<vmem>>, %arg2: memref<32x1xf32, #tpu.memory_space<vmem>>, %arg3: memref<32x1xf32, #tpu.memory_space<vmem>>, %arg4: memref<32x1xf32, #tpu.memory_space<vmem>>, %arg5: memref<1x1xf32, #tpu.memory_space<smem>>, %arg6: memref<1x128xf32, #tpu.memory_space<vmem>>) attributes {dimension_semantics = [#tpu.dimension_semantics<parallel>], iteration_bounds = array<i64: 2>, scalar_prefetch = 0 : i64, scratch_operands = 0 : i64, tpu.core_type = #tpu.core_type<tc>, window_params = [{transform_indices = @transform_0, window_bounds = array<i64: 1, 128>}, {pipeline_mode = #tpu.pipeline_mode<synchronous>, transform_indices = @transform_1, window_bounds = array<i64: 32, 1>}, {pipeline_mode = #tpu.pipeline_mode<synchronous>, transform_indices = @transform_2, window_bounds = array<i64: 32, 1>}, {pipeline_mode = #tpu.pipeline_mode<synchronous>, transform_indices = @transform_3, window_bounds = array<i64: 32, 1>}, {transform_indices = @transform_4, window_bounds = array<i64: 1, 1>}, {transform_indices = @transform_5, window_bounds = array<i64: 1, 128>}]} {
    %c0 = arith.constant 0 : index
    %c0_0 = arith.constant 0 : index
    %0 = vector.load %arg1[%c0, %c0_0] : memref<1x128xf32, #tpu.memory_space<vmem>>, vector<1x128xf32>
    %c0_1 = arith.constant 0 : index
    %c0_2 = arith.constant 0 : index
    %1 = vector.load %arg2[%c0_1, %c0_2] : memref<32x1xf32, #tpu.memory_space<vmem>>, vector<32x1xf32>
    %c0_3 = arith.constant 0 : index
    %c0_4 = arith.constant 0 : index
    %2 = vector.load %arg3[%c0_3, %c0_4] : memref<32x1xf32, #tpu.memory_space<vmem>>, vector<32x1xf32>
    %3 = vector.broadcast %1 : vector<32x1xf32> to vector<32x128xf32>
    %4 = vector.broadcast %0 : vector<1x128xf32> to vector<32x128xf32>
    %5 = arith.mulf %3, %4 : vector<32x128xf32>
    %6 = vector.broadcast %2 : vector<32x1xf32> to vector<32x128xf32>
    %7 = arith.addf %5, %6 : vector<32x128xf32>
    %8 = math.tanh %7 : vector<32x128xf32>
    %c0_5 = arith.constant 0 : index
    %c0_6 = arith.constant 0 : index
    %9 = vector.load %arg4[%c0_5, %c0_6] : memref<32x1xf32, #tpu.memory_space<vmem>>, vector<32x1xf32>
    %10 = vector.broadcast %9 : vector<32x1xf32> to vector<32x128xf32>
    %11 = arith.mulf %8, %10 : vector<32x128xf32>
    %cst = arith.constant dense<0.000000e+00> : vector<128xf32>
    %12 = vector.multi_reduction <add>, %11, %cst [0] : vector<32x128xf32> to vector<128xf32>
    %13 = vector.shape_cast %12 : vector<128xf32> to vector<1x128xf32>
    %c0_7 = arith.constant 0 : index
    %c0_8 = arith.constant 0 : index
    %14 = memref.load %arg5[%c0_7, %c0_8] : memref<1x1xf32, #tpu.memory_space<smem>>
    %15 = vector.broadcast %14 : f32 to vector<1x128xf32>
    %16 = arith.addf %13, %15 : vector<1x128xf32>
    %c0_9 = arith.constant 0 : index
    %c0_10 = arith.constant 0 : index
    %17 = vector.load %arg6[%c0_9, %c0_10] : memref<1x128xf32, #tpu.memory_space<vmem>>, vector<1x128xf32>
    tpu.vector_store %arg6[%c0_9, %c0_10], %16 {strides = array<i32>} : memref<1x128xf32, #tpu.memory_space<vmem>>, vector<1x128xf32>,
    return
  }
  func.func @transform_0(%arg0: i32) -> (i32, i32) {
    %c0_i32 = arith.constant 0 : i32
    %c0_i32_0 = arith.constant 0 : i32
    return %c0_i32, %arg0 : i32, i32
  }
  func.func @transform_1(%arg0: i32) -> (i32, i32) {
    %c0_i32 = arith.constant 0 : i32
    %c0_i32_0 = arith.constant 0 : i32
    %c0_i32_1 = arith.constant 0 : i32
    return %c0_i32, %c0_i32_0 : i32, i32
  }
  func.func @transform_2(%arg0: i32) -> (i32, i32) {
    %c0_i32 = arith.constant 0 : i32
    %c0_i32_0 = arith.constant 0 : i32
    %c0_i32_1 = arith.constant 0 : i32
    return %c0_i32, %c0_i32_0 : i32, i32
  }
  func.func @transform_3(%arg0: i32) -> (i32, i32) {
    %c0_i32 = arith.constant 0 : i32
    %c0_i32_0 = arith.constant 0 : i32
    %c0_i32_1 = arith.constant 0 : i32
    return %c0_i32, %c0_i32_0 : i32, i32
  }
  func.func @transform_4(%arg0: i32) -> (i32, i32) {
    %c0_i32 = arith.constant 0 : i32
    %c0_i32_0 = arith.constant 0 : i32
    %c0_i32_1 = arith.constant 0 : i32
    return %c0_i32, %c0_i32_0 : i32, i32
  }
  func.func @transform_5(%arg0: i32) -> (i32, i32) {
    %c0_i32 = arith.constant 0 : i32
    %c0_i32_0 = arith.constant 0 : i32
    return %c0_i32, %arg0 : i32, i32
  }
}

</mosaic_0001>

<bundles_post_ra>
// kernel: tpu_custom_call.1
= control target key start
LH: loop header
LB: loop body
LE: loop exit
PB: predicated region body
PF: predicated region fallthrough
CT: control target
= control target key end

     0   :  { %s664_s0 = inlined_call_operand.vmem [shape: f32[1,256], index: 0, kind: input, shape index: {}]   ;;  %s665_s1 = inlined_call_operand.vmem [shape: f32[32,1], index: 1, kind: input, shape index: {}]   ;;  %s666_s2 = inlined_call_operand.vmem [shape: f32[32,1], index: 2, kind: input, shape index: {}]   ;;  %s667_s3 = inlined_call_operand.vmem [shape: f32[32,1], index: 3, kind: input, shape index: {}]   ;;  %s668_s4 = inlined_call_operand.<no memory space> [shape: f32[1,1], index: 4, kind: input, shape index: {}]   ;;  %s669_s5 = inlined_call_operand.hbm [shape: f32[1,256], index: 5, kind: output, shape index: {}]  }
   0x1   :  { %10 = sst [smem:[#allocation2]] %s668_s4 }
   0x2   :  { %11 = vsyncpa [#allocation4], 0 }
   0x3   :  { %13 = vsyncpa [#allocation4 + $0x1], 0  ;;  %s543_s20 = smov 0   ;;  %s545_s21 = smov 0  }
   0x4   :  { %s547_s22 = smov 0   ;;  %s549_s23 = smov 0  }
   0x5 LB: > { %s564_s4 = sadd.s32 4294967295, %s507_s23   ;;  %s387_s24 = sadd.s32 4294967294, %s507_s23   ;;  %s507_s23 = sphi %s549_s23, %s675_s23   ;;  %s503_s22 = sphi %s547_s22, %s674_s22   ;;  %s499_s21 = sphi %s545_s21, %s673_s21   ;;  %s495_s20 = sphi %s543_s20, %s672_s20  }
   0x6   : > { %s568_s25 = sadd.s32 1, %s507_s23   ;;  %s136_s26 = sadd.s32 1, %s503_s22 }
   0x7   : > { %s133_s27 = ssub.s32 %s507_s23, %s568_s25  ;;  %p146_p0 = scmp.ne.s32.totalorder %s503_s22, %s499_s21 }
   0x8   : > { %p134_p1 = scmp.eq.s32.totalorder %s133_s27, 0  ;;  %p147_p2 = scmp.eq.s32.totalorder %s564_s4, 1 }
   0x9   : > { %p152_p3 = scmp.ne.s32.totalorder %s499_s21, %s495_s20  ;;  %p153_p4 = scmp.eq.s32.totalorder %s387_s24, 1 }
   0xa   : > { %s579_s28 = scalar_select %p134_p1, %s503_s22, %s136_s26  }
   0xb   : > { %p581_p5 = por %p147_p2, %p146_p0  ;;  %p585_p6 = por %p153_p4, %p152_p3 }
   0xc   : > { %p390_p7 = scmp.ge.s32.totalorder %s507_s23, 1  ;;  %p189_p8 = scmp.lt.s32.totalorder %s507_s23, 3 }
   0xe   : > { %p190_p9 = pnand %p390_p7, %p189_p8 }
   0xf   : > { %p214_p10 = scmp.lt.s32.totalorder (!%p190_p9), %s564_s4, 1  ;;  %s212_s18 = sand.u32 (!%p190_p9), 1, %s499_s21  }
  0x10   : > { %193 = sbr.rel (%p190_p9) target bundleno = 187 (0xbb), region = 40  ;;  %s331_s26 = scalar_lea.hbm (!%p190_p9), %s669_s5, %s564_s4 }
  0x11   : > { %s213_s27 = scalar_lea.vmem (!%p190_p9), [#allocation3], %s212_s18  ;;  %s335_s7 = sshll.u32 (!%p190_p9), %s331_s26, 4  ;;  %s336_s7 = int_to_ptr.hbm [resolvable:$true] %s335_s7 }
  0x12   : > { %s333_s6 = sshll.u32 (!%p190_p9), %s213_s27, 4  ;;  %s323_s8 = scalar_lea.sflag (!%p190_p9), [#allocation4], %s212_s18  ;;  %s334_s6 = int_to_ptr.vmem [resolvable:$true] %s333_s6 }
  0x13   : > { %s459_s9 = sshra.s32 (!%p190_p9), %s336_s7, 4  ;;  %s460_s9 = int_to_ptr.hbm [resolvable:$true] %s459_s9 }
  0x14   : > { %s461_s10 = scalar_lea.hbm (!%p190_p9), %s460_s9, 1  ;;  %p466_p0 = scmp.lt.s32.totalorder (!%p190_p9), %s460_s9, %s669_s5 }
  0x15   : > { %v220_v0 = vld [vmem:[%s665_s1 + $0x10] sm:$0xff]  ;;  %v218_v1 = vld [vmem:[%s665_s1] sm:$0xff]  ;;  %v509_v2 = vmov 0   ;;  %v223_v3 = vld [vmem:[%s666_s2 + $0x8] sm:$0xff]  ;;  %s215_s12 = scalar_select %p214_p10, %s564_s4, 1 }
  0x16   : > { %434 = vset.pattern.permute.xlu1 %v509_v2  ;;  %433 = vset.pattern.permute.xlu0 %v509_v2  ;;  %v222_v4 = vld [vmem:[%s666_s2] sm:$0xff]  ;;  %v219_v5 = vld [vmem:[%s665_s1 + $0x8] sm:$0xff]  ;;  %v221_v6 = vld [vmem:[%s665_s1 + $0x18] sm:$0xff]  ;;  %p462_p11 = scmp.ne.s32.totalorder %s460_s9, %s461_s10 }
  0x17   : > { %238 = vperm.xlu1 %434, %v220_v0   ;;  %228 = vperm.xlu0 %433, %v218_v1   ;;  %s216_s15 = scalar_lea.vmem %s664_s0, %s215_s12  ;;  %v225_v7 = vld [vmem:[%s666_s2 + $0x18] sm:$0xff]  ;;  %v224_v8 = vld [vmem:[%s666_s2 + $0x10] sm:$0xff]  ;;  %v281_v9 = vld [vmem:[%s667_s3] sm:$0xff]  ;;  %s465_s12 = scalar_lea.hbm %s669_s5, 2 }
  0x18   : > { %435 = vset.pattern.permute.xlu2 %v509_v2  ;;  %v283_v10 = vld [vmem:[%s667_s3 + $0x10] sm:$0xff]  ;;  %v282_v11 = vld [vmem:[%s667_s3 + $0x8] sm:$0xff]  ;;  %v284_v12 = vld [vmem:[%s667_s3 + $0x18] sm:$0xff]  ;;  %p463_p12 = pnand %p462_p11, %p581_p5  ;;  %p467_p1 = scmp.lt.s32.totalorder %s465_s12, %s461_s10 }
  0x19   : > { %260 = vperm.xlu2 %435, %v223_v3   ;;  %v436_v16 = vld [vmem:[%s216_s15] ss:$0 sm:$0xff]  ;;  %s318_s15 = sld [smem:[#allocation2]] }
  0x1a   : > { %p464_p13 = pneg %p463_p12  ;;  %p468_p2 = por %p467_p1, %p466_p0 }
  0x1c   : > { %p469_p3 = pnand %p468_p2, %p464_p13 }
  0x1f   : > { %255 = vperm.xlu1 %434, %v222_v4   ;;  %233 = vperm.xlu0 %433, %v219_v5   ;;  %v319_v50 = vstv %s318_s15 }
  0x21   : > { %243 = vperm.xlu2 %435, %v221_v6  }
  0x27   : > { %270 = vperm.xlu1 %434, %v225_v7   ;;  %265 = vperm.xlu0 %433, %v224_v8  }
  0x29   : > { %287 = vperm.xlu2 %435, %v281_v9  }
  0x2f   : > { %297 = vperm.xlu1 %434, %v283_v10   ;;  %292 = vperm.xlu0 %433, %v282_v11  }
  0x31   : > { %302 = vperm.xlu2 %435, %v284_v12  }
  0x73   : > { %v261_v13 = vpop.permute.xlu2 %260 }
  0x7b   : > { %v244_v17 = vpop.permute.xlu2 %243 }
  0x7c   : > { %v252_v24 = vmul.f32 %v436_v16, %v244_v17 }
  0x83   : > { %v288_v30 = vpop.permute.xlu2 %287 }
  0x89   : > { %v239_v14 = vpop.permute.xlu1 %238  ;;  %v229_v15 = vpop.permute.xlu0 %228 }
  0x8a   : > { %v249_v20 = vmul.f32 %v436_v16, %v229_v15  ;;  %v251_v25 = vmul.f32 %v436_v16, %v239_v14 }
  0x8b   : > { %v303_v41 = vpop.permute.xlu2 %302 }
  0x91   : > { %v256_v18 = vpop.permute.xlu1 %255  ;;  %v234_v19 = vpop.permute.xlu0 %233 }
  0x92   : > { %v250_v21 = vmul.f32 %v436_v16, %v234_v19  ;;  %v273_v22 = vadd.f32 %v256_v18, %v249_v20 }
  0x94   : > { %v274_v23 = vadd.f32 %v261_v13, %v250_v21  ;;  %437 = vtanh.f32 %v273_v22 }
  0x96   : > { %439 = vtanh.f32 %v274_v23 }
  0x99   : > { %v271_v26 = vpop.permute.xlu1 %270  ;;  %v266_v27 = vpop.permute.xlu0 %265 }
  0x9a   : > { %v276_v28 = vadd.f32 %v271_v26, %v252_v24  ;;  %v275_v29 = vadd.f32 %v266_v27, %v251_v25  ;;  %v438_v31 = vpop.eup %437 }
  0x9b   : > { %v305_v36 = vmul.f32 %v438_v31, %v288_v30 }
  0x9c   : > { %441 = vtanh.f32 %v276_v28  ;;  %v440_v32 = vpop.eup %439 }
  0x9d   : > { %443 = vtanh.f32 %v275_v29 }
  0xa1   : > { %v298_v33 = vpop.permute.xlu1 %297  ;;  %v293_v34 = vpop.permute.xlu0 %292 }
  0xa2   : > { %v442_v35 = vpop.eup %441  ;;  %v306_v37 = vmul.f32 %v440_v32, %v293_v34 }
  0xa3   : > { %v444_v38 = vpop.eup %443  ;;  %v308_v42 = vmul.f32 %v442_v35, %v303_v41 }
  0xa4   : > { %v307_v39 = vmul.f32 %v444_v38, %v298_v33  ;;  %v309_v40 = vadd.f32 %v306_v37, %v305_v36 }
  0xa6   : > { %v310_v43 = vadd.f32 %v309_v40, %v307_v39 }
  0xa8   : > { %v311_v44 = vadd.f32 %v310_v43, %v308_v42 }
  0xaa   : > { %v312_v45 = vrot.slane %v311_v44, 4 }
  0xac   : > { %v313_v46 = vadd.f32 %v312_v45, %v311_v44 }
  0xae   : > { %v314_v47 = vrot.slane %v313_v46, 2 }
  0xb0   : > { %v315_v48 = vadd.f32 %v314_v47, %v313_v46 }
  0xb2   : > { %v316_v49 = vrot.slane %v315_v48, 1 }
  0xb4   : > { %v317_v51 = vadd.f32 %v316_v49, %v315_v48 }
  0xb6   : > { %v320_v52 = vadd.f32 %v319_v50, %v317_v51 }
  0xb8   : > { %321 = vst [vmem:[%s213_s27] sm:$0x1] %v320_v52 }
  0xb9   : > { %472 = shalt.err (!%p469_p3)
}
  0xba   : > { %393 = dma.vmem_to_hbm [thread:$0]  (%p581_p5), %s334_s6, 16, %s336_s7, %s323_s8  }
  0xbb PF: > { %p399_p4 = scmp.ge.s32.totalorder %s507_s23, 2  ;;  %s347_s16 = sand.u32 1, %s495_s20  }
  0xbc   : > { %s348_s17 = scalar_lea.sflag [#allocation4], %s347_s16 }
  0xbd   : > { %p396_p7 = pnand %p399_p4, %p585_p6 }
  0xbf   : > { %p397_p8 = pneg %p396_p7 }
  0xc1   : > { %490 = dma.done.wait (%p397_p8), %s348_s17, 16  }
  0xc2   : > { %492 = vsyncadd (%p397_p8), %s348_s17, 4294967280  ;;  %p16_p9 = scmp.ge.s32.totalorder %s568_s25, 4   ;;  %s672_s20 = smov %s499_s21 }
  0xc3   : > { %s673_s21 = smov %s503_s22  ;;  %s674_s22 = smov %s579_s28 }
  0xc4   : > { %s675_s23 = smov %s568_s25  ;;  %18 = sbr.rel (!%p16_p9) target bundleno = 5 (0x5), region = 75 }
  0xc9   :  { %353 = vsyncpa [#allocation4], 1 }
  0xca   :  { %355 = vsyncpa [#allocation4 + $0x1], 1 }

</bundles_post_ra>
